<compile_context>
chip_gen: v5e
topology: v5e:2x2
jax: 0.10.0
libtpu: 0.0.40
codegen_flags: <defaults>
</compile_context>

<pallas_src>
import jax
import jax.numpy as jnp
from jax.experimental import pallas as pl
from jax.experimental.pallas import tpu as pltpu

_MIB = 1024 * 1024


def _chip_config():
    """Per-generation streaming params: (target_block_bytes, vmem_limit_bytes, bf16_native)."""
    kind = ""
    try:
        kind = jax.devices()[0].device_kind.lower()
    except Exception:
        pass
    vmem_cap = None
    try:
        vmem_cap = getattr(pltpu.get_tpu_info(), "vmem_capacity_bytes", None)
    except Exception:
        pass
    is_v7 = ("v7" in kind) or (vmem_cap is not None and vmem_cap <= 96 * _MIB)
    if is_v7:
        # 64 MiB VMEM/TC, ~3.2 TB/s HBM: larger blocks amortize the ~0.35us/step
        # overhead; 8 MiB x 2-deep x (in+out) = 32 MiB, comfortably under 48 MiB.
        return 8 * _MIB, 48 * _MIB, True
    if "v5" in kind:
        # Default scoped VMEM is only 16 MiB on v5e -> keep the explicit override.
        # No bf16 VALU on v5e: keep f32 compute.
        return 4 * _MIB, 32 * _MIB, False
    # v6e (and unknown) default: physical VMEM is 128 MiB, 8 MiB blocks are cheap.
    return 8 * _MIB, 40 * _MIB, True


def _make_affine_kernel(compute_dtype):
    def kernel(params_ref, x_ref, o_ref):
        # params_ref is the scalar-prefetch ref in SMEM: [alpha, delta] (f32).
        alpha = params_ref[0].astype(compute_dtype)
        delta = params_ref[1].astype(compute_dtype)
        o_ref[...] = (x_ref[...].astype(compute_dtype) * alpha + delta).astype(o_ref.dtype)
    return kernel


def _pick_lanes(total):
    """Widest 128-multiple divisor of `total`, preferring one that keeps rows >= 8."""
    widest = None
    max_k = min(total // 128, 64)  # lane widths up to 8192
    for k in range(max_k, 0, -1):
        lanes = 128 * k
        if total % lanes == 0:
            if widest is None:
                widest = lanes
            if total // lanes >= 8:
                return lanes       # widest divisor giving at least one full sublane tile
    return widest                  # None iff total % 128 != 0


def _affine_slab(x2d, params, compute_dtype, target_block_bytes, vmem_limit_bytes):
    rows, lanes = x2d.shape
    itemsize = x2d.dtype.itemsize
    lanes_pad = -(-lanes // 128) * 128          # VMEM footprint is lane-padded
    bytes_per_row = lanes_pad * itemsize

    # Rows per block from the per-generation byte target, sublane-tile aligned.
    block_rows = max(1, target_block_bytes // bytes_per_row)
    block_rows = max(32, (block_rows // 32) * 32)
    if block_rows >= rows:
        # Whole tensor fits in one block: split into two grid steps when rows
        # allow it so dimension_semantics=('parallel',) can shard across both
        # v7x TensorCores (no effect on 1-TC v5e/v6e).
        half = -(-rows // 2)
        half = -(-half // 32) * 32
        block_rows = half if half < rows else rows

    grid = (-(-rows // block_rows),)

    return pl.pallas_call(
        _make_affine_kernel(compute_dtype),
        out_shape=jax.ShapeDtypeStruct((rows, lanes), x2d.dtype),
        grid_spec=pltpu.PrefetchScalarGridSpec(
            num_scalar_prefetch=1,              # alpha/delta -> SMEM once, not per step
            grid=grid,
            in_specs=[pl.BlockSpec((block_rows, lanes), lambda i, p: (i, 0))],
            out_specs=pl.BlockSpec((block_rows, lanes), lambda i, p: (i, 0)),
        ),
        compiler_params=pltpu.CompilerParams(
            dimension_semantics=("parallel",),   # megacore / 2-TC grid sharding
            vmem_limit_bytes=vmem_limit_bytes,
        ),
        cost_estimate=pl.CostEstimate(
            flops=2 * rows * lanes,
            transcendentals=0,
            bytes_accessed=2 * rows * lanes * itemsize,
        ),
    )(params, x2d)


def overall_affine(x, alpha, delta):
    """Elementwise f(x) = alpha * x + delta via a Pallas TPU kernel.

    Semantics vs the PyTorch module:
      * f32 inputs match exactly.
      * bf16 inputs compute natively in bf16 on v6e/v7x (f32 on v5e), so the
        result can differ from a torch forward in the last ulp.
      * integer inputs are computed in f32 and truncated back to the integer
        dtype; PyTorch would promote to float.
    """
    target_block_bytes, vmem_limit_bytes, bf16_native = _chip_config()
    compute_dtype = (jnp.bfloat16
                     if (bf16_native and x.dtype == jnp.bfloat16)
                     else jnp.float32)
    params = jnp.array([alpha, delta], dtype=jnp.float32)

    orig_shape = x.shape
    total = int(x.size)
    if total == 0:
        return x
    itemsize = x.dtype.itemsize

    # Path A: a 128-multiple divisor of total exists -> lane-dense slab, zero copies.
    lanes = _pick_lanes(total)
    if lanes is not None:
        rows = total // lanes
        x2d = jnp.ravel(x).reshape(rows, lanes)
        out2d = _affine_slab(x2d, params, compute_dtype,
                             target_block_bytes, vmem_limit_bytes)
        return out2d.reshape(orig_shape)

    # Path B: ragged total, ndim >= 2 -> view as (prod(leading), last_dim) with a
    # full-extent (masked) lane dim. No pad/unpad round trip: HBM traffic stays 1R+1W.
    if x.ndim >= 2:
        lanes = x.shape[-1]
        rows = total // lanes
        lanes_pad = -(-lanes // 128) * 128
        # Only if the minimum (32-row) block still fits the VMEM budget.
        if 4 * (32 * lanes_pad * itemsize) <= vmem_limit_bytes - 4 * _MIB:
            x2d = x.reshape(rows, lanes)
            out2d = _affine_slab(x2d, params, compute_dtype,
                                 target_block_bytes, vmem_limit_bytes)
            return out2d.reshape(orig_shape)

    # Path C: flat ragged input -> kernel on the largest 128-aligned prefix; the
    # <128-element tail is a trivial XLA op (no padded copy of the full tensor).
    x_flat = jnp.ravel(x)
    main = (total // 128) * 128
    tail = x_flat[main:]
    tail_out = (tail.astype(compute_dtype) * jnp.asarray(alpha, dtype=compute_dtype)
                + jnp.asarray(delta, dtype=compute_dtype)).astype(x.dtype)
    if main == 0:
        return tail_out.reshape(orig_shape)
    lanes = _pick_lanes(main)
    rows = main // lanes
    head2d = x_flat[:main].reshape(rows, lanes)
    head_out = _affine_slab(head2d, params, compute_dtype,
                            target_block_bytes, vmem_limit_bytes).reshape(-1)
    return jnp.concatenate([head_out, tail_out]).reshape(orig_shape)


if __name__ == "__main__":
    # Deterministic setup matching OverallAffineLayer.__init__ defaults.
    alpha = 10.0
    delta = 0.0

    # Main case (small NCHW tensor): exercises the lane-dense divisor path.
    x = jax.random.normal(jax.random.PRNGKey(0), (2, 4, 16, 16), dtype=jnp.float32)
    y = jax.block_until_ready(overall_affine(x, alpha, delta))
    y_ref = x * alpha + delta
    assert y.shape == x.shape and y.dtype == x.dtype
    assert jnp.allclose(y, y_ref, atol=1e-6, rtol=1e-6)

    # Ragged total, ndim >= 2: exercises the full-extent-lane path (no pad copy).
    x2 = jax.random.normal(jax.random.PRNGKey(0), (3, 5, 7), dtype=jnp.float32)
    y2 = jax.block_until_ready(overall_affine(x2, alpha, delta))
    assert jnp.allclose(y2, x2 * alpha + delta, atol=1e-6, rtol=1e-6)

    # Ragged flat input: exercises the prefix-kernel + XLA-tail path.
    x3 = jax.random.normal(jax.random.PRNGKey(0), (1000,), dtype=jnp.float32)
    y3 = jax.block_until_ready(overall_affine(x3, alpha, delta))
    assert jnp.allclose(y3, x3 * alpha + delta, atol=1e-6, rtol=1e-6)

    print("KERNEL_OK")
</pallas_src>

<mosaic_0001>
module attributes {stable_mosaic.version = 11 : i64} {
  func.func @kernel(%arg0: i32, %arg1: memref<2xf32, #tpu.memory_space<smem>>, %arg2: memref<8x256xf32, #tpu.memory_space<vmem>>, %arg3: memref<8x256xf32, #tpu.memory_space<vmem>>) attributes {dimension_semantics = [#tpu.dimension_semantics<parallel>], iteration_bounds = array<i64: 1>, scalar_prefetch = 1 : i64, scratch_operands = 0 : i64, tpu.core_type = #tpu.core_type<tc>, window_params = [{transform_indices = @transform_0, window_bounds = array<i64: 8, 256>}, {transform_indices = @transform_1, window_bounds = array<i64: 8, 256>}]} {
    %c0 = arith.constant 0 : index
    %0 = memref.load %arg1[%c0] : memref<2xf32, #tpu.memory_space<smem>>
    %c1 = arith.constant 1 : index
    %1 = memref.load %arg1[%c1] : memref<2xf32, #tpu.memory_space<smem>>
    %c0_0 = arith.constant 0 : index
    %c0_1 = arith.constant 0 : index
    %2 = vector.load %arg2[%c0_0, %c0_1] : memref<8x256xf32, #tpu.memory_space<vmem>>, vector<8x256xf32>
    %3 = vector.broadcast %0 : f32 to vector<8x256xf32>
    %4 = arith.mulf %2, %3 : vector<8x256xf32>
    %5 = vector.broadcast %1 : f32 to vector<8x256xf32>
    %6 = arith.addf %4, %5 : vector<8x256xf32>
    %c0_2 = arith.constant 0 : index
    %c0_3 = arith.constant 0 : index
    %7 = vector.load %arg3[%c0_2, %c0_3] : memref<8x256xf32, #tpu.memory_space<vmem>>, vector<8x256xf32>
    tpu.vector_store %arg3[%c0_2, %c0_3], %6 {strides = array<i32>} : memref<8x256xf32, #tpu.memory_space<vmem>>, vector<8x256xf32>,
    return
  }
  func.func @transform_0(%arg0: i32, %arg1: memref<2xf32, #tpu.memory_space<smem>>) -> (i32, i32) {
    %c0_i32 = arith.constant 0 : i32
    %c0_i32_0 = arith.constant 0 : i32
    return %arg0, %c0_i32 : i32, i32
  }
  func.func @transform_1(%arg0: i32, %arg1: memref<2xf32, #tpu.memory_space<smem>>) -> (i32, i32) {
    %c0_i32 = arith.constant 0 : i32
    %c0_i32_0 = arith.constant 0 : i32
    return %arg0, %c0_i32 : i32, i32
  }
}

</mosaic_0001>

<bundles_post_ra>
// kernel: tpu_custom_call.1
= control target key start
LH: loop header
LB: loop body
LE: loop exit
PB: predicated region body
PF: predicated region fallthrough
CT: control target
= control target key end

     0   :  { %s131_s12 = smov [#allocation3]   ;;  %s158_s0 = inlined_call_operand.hbm [shape: f32[2], index: 0, kind: input, shape index: {}]   ;;  %s159_s1 = inlined_call_operand.hbm [shape: f32[8,256], index: 1, kind: input, shape index: {}]   ;;  %s160_s2 = inlined_call_operand.hbm [shape: f32[8,256], index: 2, kind: output, shape index: {}]  }
   0x1   :  { %s8_s11 = sshll.u32 %s158_s0, 4  ;;  %s9_s11 = int_to_ptr.hbm [resolvable:$true] %s8_s11 }
   0x2   :  { %11 = dma.hbm_to_smem %s9_s11, 16, %s131_s12, [#allocation2] }
   0x3   :  { %125 = dma.done.wait [#allocation2], 16 }
   0x4   :  { %126 = vsyncadd [#allocation2], 4294967280 }
   0x5   :  { %14 = sfence }
   0x6   :  { %15 = vsyncpa [#allocation5], 0 }
   0x7   :  { %16 = vsyncpa [#allocation6], 0  ;;  %s22_s15 = sshll.u32 %s159_s1, 4  ;;  %s132_s16 = smov [#allocation4]   ;;  %s23_s15 = int_to_ptr.hbm [resolvable:$true] %s22_s15 }
   0x8   :  { %s24_s17 = sshll.u32 %s132_s16, 4  ;;  %s25_s17 = int_to_ptr.vmem [resolvable:$true] %s24_s17 }
   0x9   :  { %27 = dma.hbm_to_vmem [thread:$0]  %s23_s15, 256, %s25_s17, [#allocation5]  }
   0xa   :  { %127 = dma.done.wait [#allocation5], 256  }
   0xb   :  { %128 = vsyncadd [#allocation5], 4294967040  ;;  %s32_s0 = sld [smem:[#allocation3]]  ;;  %v34_v0 = vld [vmem:[#allocation4] sm:$0xff]  ;;  %v35_v2 = vld [vmem:[#allocation4 + $0x8] sm:$0xff]  ;;  %s133_s19 = smov [#allocation7]  }
   0xc   :  { %s61_s18 = sld [smem:[#allocation3 + $0x1]]  ;;  %s49_s20 = sshll.u32 %s133_s19, 4  ;;  %s50_s20 = int_to_ptr.vmem [resolvable:$true] %s49_s20 }
   0xd   :  { %s51_s1 = sshll.u32 %s160_s2, 4  ;;  %s52_s1 = int_to_ptr.hbm [resolvable:$true] %s51_s1 }
  0x11   :  { %v36_v1 = vstv %s32_s0 }
  0x12   :  { %v37_v3 = vmul.f32 %v36_v1, %v34_v0  ;;  %v39_v4 = vstv %s61_s18  ;;  %v38_v5 = vmul.f32 %v36_v1, %v35_v2 }
  0x14   :  { %v40_v6 = vadd.f32 %v39_v4, %v37_v3  ;;  %v41_v7 = vadd.f32 %v39_v4, %v38_v5 }
  0x16   :  { %42 = vst [vmem:[#allocation7] sm:$0xff] %v40_v6 }
  0x17   :  { %43 = vst [vmem:[#allocation7 + $0x8] sm:$0xff] %v41_v7 }
  0x18   :  { %54 = dma.vmem_to_hbm [thread:$0]  %s50_s20, 256, %s52_s1, [#allocation6]  }
  0x19   :  { %129 = dma.done.wait [#allocation6], 256  }
  0x1a   :  { %130 = vsyncadd [#allocation6], 4294967040 }
  0x1b   :  { %59 = vsyncpa [#allocation5], 1 }
  0x1c   :  { %60 = vsyncpa [#allocation6], 1 }

</bundles_post_ra>
